<compile_context>
chip_gen: v6e
topology: v6e:2x2x1
jax: 0.10.0
libtpu: 0.0.40
codegen_flags: <defaults>
</compile_context>

<pallas_src>
import jax
import jax.numpy as jnp
from jax import lax
from jax.experimental import pallas as pl
from jax.experimental.pallas import tpu as pltpu

N_HEADS = 2
N_CLASSES = 2
MAX_SEQ = 5
N_HIDDEN = 5
VOCAB = 11

# Packed parameter buffer layout (f32, shape (_PACK_ROWS, _PACK_COLS)).
# Row offsets are 8-aligned so every in-kernel slice is a trivially aligned load.
_PACK_COLS = (1 + 3 * N_HEADS) * N_HIDDEN   # [emb | q0 k0 v0' | q1 k1 v1'] = 35 lanes
_ROW_TABLE = 0                              # rows 0:11   fused embedding table (VOCAB, 7H)
_ROW_ATT_BIAS = 16                          # row  16     folded attention-output bias (1, H)
_ROW_WO_DIFF = 24                           # rows 24:29  Wo[class1]-Wo[class0] (MAX_SEQ, H)
_ROW_B_DIFF = 32                            # row  32     bo[1]-bo[0]           (1, 1)
_PACK_ROWS = _ROW_B_DIFF + 1


def nn_kernel(tok_ref, par_ref, out_ref):
    """tok_ref: (S,) int32 in SMEM; par_ref: (_PACK_ROWS, _PACK_COLS) f32 in VMEM."""
    S = tok_ref.shape[0]
    H = N_HIDDEN

    # --- one-hot rows built from SMEM scalar reads (no vector DMA for token ids) ---
    col = lax.broadcasted_iota(jnp.int32, (S, VOCAB), 1)
    row = lax.broadcasted_iota(jnp.int32, (S, VOCAB), 0)
    onehot = jnp.zeros((S, VOCAB), jnp.float32)
    for i in range(S):                                        # S <= 5, static unroll
        onehot = jnp.where((row == i) & (col == tok_ref[i]), 1.0, onehot)

    # --- single fused lookup: [emb | q0 | k0 | v0' | q1 | k1 | v1'] -> (S, 7H) ---
    fused = jnp.dot(onehot, par_ref[_ROW_TABLE:_ROW_TABLE + VOCAB, :],
                    preferred_element_type=jnp.float32)
    emb = fused[:, 0:H]

    # --- per-head attention; value (applied twice) and projection already folded into v' ---
    acc = jnp.zeros((S, H), jnp.float32)
    for h in range(N_HEADS):
        base = (1 + 3 * h) * H
        q = fused[:, base:base + H]
        k = fused[:, base + H:base + 2 * H]
        v3 = fused[:, base + 2 * H:base + 3 * H]

        # q @ k^T without an explicit transpose
        att = lax.dot_general(q, k, (((1,), (1,)), ((), ())),
                              preferred_element_type=jnp.float32)       # (S, S)
        m = jnp.max(att, axis=-1, keepdims=True)
        e = jnp.exp(att - m)
        p = e * pl.reciprocal(jnp.sum(e, axis=-1, keepdims=True), approx=True)
        acc = acc + jnp.dot(p, v3, preferred_element_type=jnp.float32)  # (S, H)

    att_bias = par_ref[_ROW_ATT_BIAS:_ROW_ATT_BIAS + 1, 0:H]            # (1, H)
    with_skip = emb + acc + att_bias                                    # (S, H)

    # --- output Linear(25, 2) + 2-class softmax fused into ONE reduction:
    #     softmax([l0, l1])[1] == sigmoid(l1 - l0); zero-padded rows (>= S) never contribute.
    wo_diff = par_ref[_ROW_WO_DIFF:_ROW_WO_DIFF + S, 0:H]               # (S, H)
    d = jnp.sum(jnp.sum(with_skip * wo_diff, axis=1, keepdims=True),
                axis=0, keepdims=True)                                  # (1, 1)
    d = d + par_ref[_ROW_B_DIFF:_ROW_B_DIFF + 1, 0:1]
    out_ref[...] = pl.reciprocal(1.0 + jnp.exp(-d), approx=True)        # sigmoid(d)


def pack_params(params):
    """Wrapper-side (one-time) algebraic fold + packing into a single f32 buffer."""
    H = N_HIDDEN
    table = params["table"]                       # (VOCAB, H)
    wp, bp = params["wp"], params["bp"]           # (2H, H), (1, H)

    cols = [table]
    att_bias = bp
    for h in range(N_HEADS):
        wq, bq = params["wq"][h], params["bq"][h]
        wk, bk = params["wk"][h], params["bk"][h]
        wv, bv = params["wv"][h], params["bv"][h]
        wp_h = wp[h * H:(h + 1) * H, :]           # (H, H) slice of the projection
        wvp = wv @ wp_h
        # head_out_h @ wp_h = p_h @ (emb @ (Wv Wv Wp_h) + bv Wv Wp_h) + bv Wp_h
        cols += [table @ wq + bq,                 # q_h lookup rows
                 table @ wk + bk,                 # k_h lookup rows
                 table @ (wv @ wvp) + bv @ wvp]   # v'_h lookup rows (value twice + projection)
        att_bias = att_bias + bv @ wp_h
    fused_table = jnp.concatenate(cols, axis=1)   # (VOCAB, 7H)

    wo, bo = params["wo"], params["bo"]           # (2, MAX_SEQ, H), (1, 2)
    wo_diff = wo[1] - wo[0]                       # (MAX_SEQ, H)
    b_diff = (bo[0, 1] - bo[0, 0]).reshape(1, 1)

    buf = jnp.zeros((_PACK_ROWS, _PACK_COLS), jnp.float32)
    buf = buf.at[_ROW_TABLE:_ROW_TABLE + VOCAB, :].set(fused_table)
    buf = buf.at[_ROW_ATT_BIAS:_ROW_ATT_BIAS + 1, 0:H].set(att_bias)
    buf = buf.at[_ROW_WO_DIFF:_ROW_WO_DIFF + MAX_SEQ, 0:H].set(wo_diff)
    buf = buf.at[_ROW_B_DIFF:_ROW_B_DIFF + 1, 0:1].set(b_diff)
    return buf


def neural_network_forward(year_tokens, packed_params):
    """year_tokens: (1, S) int32 token ids, S <= MAX_SEQ. Returns softmax(logits)[1]."""
    tok = year_tokens.reshape(-1).astype(jnp.int32)           # (S,) -> SMEM
    assert tok.shape[0] <= MAX_SEQ

    prob = pl.pallas_call(
        nn_kernel,
        out_shape=jax.ShapeDtypeStruct((1, 1), jnp.float32),
        in_specs=[pl.BlockSpec(memory_space=pltpu.MemorySpace.SMEM),   # token ids
                  pl.BlockSpec(memory_space=pltpu.MemorySpace.VMEM)],  # packed params (1 DMA)
        out_specs=pl.BlockSpec(memory_space=pltpu.MemorySpace.VMEM),
    )(tok, packed_params)
    return prob[0, 0]


def init_params(key):
    """Deterministic synthetic params, mimicking PyTorch default init shapes."""
    ks = jax.random.split(key, 12)

    def lin(k, fan_in, shape):
        bound = 1.0 / jnp.sqrt(jnp.float32(fan_in))
        return jax.random.uniform(k, shape, jnp.float32, -bound, bound)

    H = N_HIDDEN
    return {
        # Embedding(11, 5): N(0, 1)
        "table": jax.random.normal(ks[0], (VOCAB, H), jnp.float32),
        # per-head query/key/value Linear(5,5): weights stored as (in,out)
        "wq": lin(ks[1], H, (N_HEADS, H, H)), "bq": lin(ks[2], H, (N_HEADS, 1, H)),
        "wk": lin(ks[3], H, (N_HEADS, H, H)), "bk": lin(ks[4], H, (N_HEADS, 1, H)),
        "wv": lin(ks[5], H, (N_HEADS, H, H)), "bv": lin(ks[6], H, (N_HEADS, 1, H)),
        # projection Linear(10, 5), stored transposed (10, 5)
        "wp": lin(ks[7], N_HEADS * H, (N_HEADS * H, H)),
        "bp": lin(ks[8], N_HEADS * H, (1, H)),
        # output Linear(25, 2): (2, 25) viewed as (2, 5, 5) (row-major == flatten order)
        "wo": lin(ks[9], H * MAX_SEQ, (N_CLASSES, MAX_SEQ, H)),
        "bo": lin(ks[10], H * MAX_SEQ, (1, N_CLASSES)),
    }


def _reference_forward(year_tokens, params):
    """Pure-JAX reference matching the PyTorch module semantics (unfolded params)."""
    tok = year_tokens.reshape(-1).astype(jnp.int32)
    emb = params["table"][tok]                                        # (S, H)
    heads = []
    for h in range(N_HEADS):
        q = emb @ params["wq"][h] + params["bq"][h]
        k = emb @ params["wk"][h] + params["bk"][h]
        v = emb @ params["wv"][h] + params["bv"][h]
        att = q @ k.T
        p = jax.nn.softmax(att, axis=-1)
        # NOTE: reference module applies the value layer a second time
        heads.append((p @ v) @ params["wv"][h] + params["bv"][h])
    concat = jnp.concatenate(heads, axis=-1)
    att_out = concat @ params["wp"] + params["bp"]
    with_skip = emb + att_out
    padded = jnp.zeros((MAX_SEQ, N_HIDDEN), jnp.float32).at[:with_skip.shape[0]].set(with_skip)
    logits = padded.reshape(-1) @ params["wo"].reshape(N_CLASSES, -1).T + params["bo"][0]
    return jax.nn.softmax(logits, axis=-1)[1]


if __name__ == "__main__":
    key = jax.random.PRNGKey(0)
    params = init_params(key)
    packed = pack_params(params)          # one-time wrapper-side fold + pack

    # "year" input: (1, 5) token ids in [0, 11)
    year = jax.random.randint(jax.random.PRNGKey(0), (1, MAX_SEQ), 0, VOCAB, dtype=jnp.int32)

    out = neural_network_forward(year, packed)
    out = jax.block_until_ready(out)

    ref = _reference_forward(year, params)
    # Slightly loosened tolerance only because the kernel uses the EUP approx
    # reciprocal for the softmax/sigmoid denominators (per perf review).
    assert jnp.allclose(out, ref, rtol=5e-3, atol=5e-3), (out, ref)
    print("KERNEL_OK")
</pallas_src>

<mosaic_0001>
module attributes {stable_mosaic.version = 11 : i64} {
  func.func @nn_kernel(%arg0: memref<5xi32, #tpu.memory_space<smem>>, %arg1: memref<33x35xf32, #tpu.memory_space<vmem>>, %arg2: memref<1x1xf32, #tpu.memory_space<vmem>>) attributes {dimension_semantics = [], scalar_prefetch = 0 : i64, scratch_operands = 0 : i64, tpu.core_type = #tpu.core_type<tc>} {
    %0 = tpu.iota {dimensions = array<i32: 1>} : vector<5x11xi32>
    %1 = tpu.iota {dimensions = array<i32: 0>} : vector<5x11xi32>
    %cst = arith.constant 0.000000e+00 : f32
    %2 = vector.broadcast %cst : f32 to vector<5x11xf32>
    %c0_i32 = arith.constant 0 : i32
    %3 = vector.broadcast %c0_i32 : i32 to vector<5x11xi32>
    %4 = arith.cmpi eq, %1, %3 : vector<5x11xi32>
    %c0 = arith.constant 0 : index
    %5 = memref.load %arg0[%c0] : memref<5xi32, #tpu.memory_space<smem>>
    %6 = vector.broadcast %5 : i32 to vector<5x11xi32>
    %7 = arith.cmpi eq, %0, %6 : vector<5x11xi32>
    %8 = arith.andi %4, %7 : vector<5x11xi1>
    %cst_0 = arith.constant 1.000000e+00 : f32
    %9 = vector.broadcast %cst_0 : f32 to vector<5x11xf32>
    %10 = arith.select %8, %9, %2 : vector<5x11xi1>, vector<5x11xf32>
    %c1_i32 = arith.constant 1 : i32
    %11 = vector.broadcast %c1_i32 : i32 to vector<5x11xi32>
    %12 = arith.cmpi eq, %1, %11 : vector<5x11xi32>
    %c1 = arith.constant 1 : index
    %13 = memref.load %arg0[%c1] : memref<5xi32, #tpu.memory_space<smem>>
    %14 = vector.broadcast %13 : i32 to vector<5x11xi32>
    %15 = arith.cmpi eq, %0, %14 : vector<5x11xi32>
    %16 = arith.andi %12, %15 : vector<5x11xi1>
    %cst_1 = arith.constant 1.000000e+00 : f32
    %17 = vector.broadcast %cst_1 : f32 to vector<5x11xf32>
    %18 = arith.select %16, %17, %10 : vector<5x11xi1>, vector<5x11xf32>
    %c2_i32 = arith.constant 2 : i32
    %19 = vector.broadcast %c2_i32 : i32 to vector<5x11xi32>
    %20 = arith.cmpi eq, %1, %19 : vector<5x11xi32>
    %c2 = arith.constant 2 : index
    %21 = memref.load %arg0[%c2] : memref<5xi32, #tpu.memory_space<smem>>
    %22 = vector.broadcast %21 : i32 to vector<5x11xi32>
    %23 = arith.cmpi eq, %0, %22 : vector<5x11xi32>
    %24 = arith.andi %20, %23 : vector<5x11xi1>
    %cst_2 = arith.constant 1.000000e+00 : f32
    %25 = vector.broadcast %cst_2 : f32 to vector<5x11xf32>
    %26 = arith.select %24, %25, %18 : vector<5x11xi1>, vector<5x11xf32>
    %c3_i32 = arith.constant 3 : i32
    %27 = vector.broadcast %c3_i32 : i32 to vector<5x11xi32>
    %28 = arith.cmpi eq, %1, %27 : vector<5x11xi32>
    %c3 = arith.constant 3 : index
    %29 = memref.load %arg0[%c3] : memref<5xi32, #tpu.memory_space<smem>>
    %30 = vector.broadcast %29 : i32 to vector<5x11xi32>
    %31 = arith.cmpi eq, %0, %30 : vector<5x11xi32>
    %32 = arith.andi %28, %31 : vector<5x11xi1>
    %cst_3 = arith.constant 1.000000e+00 : f32
    %33 = vector.broadcast %cst_3 : f32 to vector<5x11xf32>
    %34 = arith.select %32, %33, %26 : vector<5x11xi1>, vector<5x11xf32>
    %c4_i32 = arith.constant 4 : i32
    %35 = vector.broadcast %c4_i32 : i32 to vector<5x11xi32>
    %36 = arith.cmpi eq, %1, %35 : vector<5x11xi32>
    %c4 = arith.constant 4 : index
    %37 = memref.load %arg0[%c4] : memref<5xi32, #tpu.memory_space<smem>>
    %38 = vector.broadcast %37 : i32 to vector<5x11xi32>
    %39 = arith.cmpi eq, %0, %38 : vector<5x11xi32>
    %40 = arith.andi %36, %39 : vector<5x11xi1>
    %cst_4 = arith.constant 1.000000e+00 : f32
    %41 = vector.broadcast %cst_4 : f32 to vector<5x11xf32>
    %42 = arith.select %40, %41, %34 : vector<5x11xi1>, vector<5x11xf32>
    %c0_5 = arith.constant 0 : index
    %c0_6 = arith.constant 0 : index
    %43 = vector.load %arg1[%c0_5, %c0_6] : memref<33x35xf32, #tpu.memory_space<vmem>>, vector<11x35xf32>
    %cst_7 = arith.constant dense<0.000000e+00> : vector<5x35xf32>
    %44 = tpu.matmul %42, %43, %cst_7 {dimension_numbers = #tpu.dot_dimension_numbers<[1], [0], [0], [1], [0, 0, 1, 1], [], []>} : vector<5x11xf32>, vector<11x35xf32>, vector<5x35xf32> -> vector<5x35xf32>
    %45 = vector.extract_strided_slice %44 {offsets = [0, 0], sizes = [5, 5], strides = [1, 1]} : vector<5x35xf32> to vector<5x5xf32>
    %cst_8 = arith.constant 0.000000e+00 : f32
    %46 = vector.broadcast %cst_8 : f32 to vector<5x5xf32>
    %47 = vector.extract_strided_slice %44 {offsets = [0, 5], sizes = [5, 5], strides = [1, 1]} : vector<5x35xf32> to vector<5x5xf32>
    %48 = vector.extract_strided_slice %44 {offsets = [0, 10], sizes = [5, 5], strides = [1, 1]} : vector<5x35xf32> to vector<5x5xf32>
    %49 = vector.extract_strided_slice %44 {offsets = [0, 15], sizes = [5, 5], strides = [1, 1]} : vector<5x35xf32> to vector<5x5xf32>
    %cst_9 = arith.constant dense<0.000000e+00> : vector<5x5xf32>
    %50 = tpu.matmul %47, %48, %cst_9 {dimension_numbers = #tpu.dot_dimension_numbers<[1], [1], [0], [0], [0, 0, 1, 0], [], []>} : vector<5x5xf32>, vector<5x5xf32>, vector<5x5xf32> -> vector<5x5xf32>
    %cst_10 = arith.constant dense<0xFF800000> : vector<5xf32>
    %51 = vector.multi_reduction <maximumf>, %50, %cst_10 [1] : vector<5x5xf32> to vector<5xf32>
    %52 = vector.shape_cast %51 : vector<5xf32> to vector<5x1xf32>
    %53 = vector.broadcast %52 : vector<5x1xf32> to vector<5x5xf32>
    %54 = arith.subf %50, %53 : vector<5x5xf32>
    %55 = math.exp %54 : vector<5x5xf32>
    %cst_11 = arith.constant dense<0.000000e+00> : vector<5xf32>
    %56 = vector.multi_reduction <add>, %55, %cst_11 [1] : vector<5x5xf32> to vector<5xf32>
    %57 = vector.shape_cast %56 : vector<5xf32> to vector<5x1xf32>
    %58 = tpu.reciprocal %57 {approx = true} : vector<5x1xf32> -> vector<5x1xf32>
    %59 = vector.broadcast %58 : vector<5x1xf32> to vector<5x5xf32>
    %60 = arith.mulf %55, %59 : vector<5x5xf32>
    %cst_12 = arith.constant dense<0.000000e+00> : vector<5x5xf32>
    %61 = tpu.matmul %60, %49, %cst_12 {dimension_numbers = #tpu.dot_dimension_numbers<[1], [0], [0], [1], [0, 0, 1, 1], [], []>} : vector<5x5xf32>, vector<5x5xf32>, vector<5x5xf32> -> vector<5x5xf32>
    %62 = arith.addf %46, %61 : vector<5x5xf32>
    %63 = vector.extract_strided_slice %44 {offsets = [0, 20], sizes = [5, 5], strides = [1, 1]} : vector<5x35xf32> to vector<5x5xf32>
    %64 = vector.extract_strided_slice %44 {offsets = [0, 25], sizes = [5, 5], strides = [1, 1]} : vector<5x35xf32> to vector<5x5xf32>
    %65 = vector.extract_strided_slice %44 {offsets = [0, 30], sizes = [5, 5], strides = [1, 1]} : vector<5x35xf32> to vector<5x5xf32>
    %cst_13 = arith.constant dense<0.000000e+00> : vector<5x5xf32>
    %66 = tpu.matmul %63, %64, %cst_13 {dimension_numbers = #tpu.dot_dimension_numbers<[1], [1], [0], [0], [0, 0, 1, 0], [], []>} : vector<5x5xf32>, vector<5x5xf32>, vector<5x5xf32> -> vector<5x5xf32>
    %cst_14 = arith.constant dense<0xFF800000> : vector<5xf32>
    %67 = vector.multi_reduction <maximumf>, %66, %cst_14 [1] : vector<5x5xf32> to vector<5xf32>
    %68 = vector.shape_cast %67 : vector<5xf32> to vector<5x1xf32>
    %69 = vector.broadcast %68 : vector<5x1xf32> to vector<5x5xf32>
    %70 = arith.subf %66, %69 : vector<5x5xf32>
    %71 = math.exp %70 : vector<5x5xf32>
    %cst_15 = arith.constant dense<0.000000e+00> : vector<5xf32>
    %72 = vector.multi_reduction <add>, %71, %cst_15 [1] : vector<5x5xf32> to vector<5xf32>
    %73 = vector.shape_cast %72 : vector<5xf32> to vector<5x1xf32>
    %74 = tpu.reciprocal %73 {approx = true} : vector<5x1xf32> -> vector<5x1xf32>
    %75 = vector.broadcast %74 : vector<5x1xf32> to vector<5x5xf32>
    %76 = arith.mulf %71, %75 : vector<5x5xf32>
    %cst_16 = arith.constant dense<0.000000e+00> : vector<5x5xf32>
    %77 = tpu.matmul %76, %65, %cst_16 {dimension_numbers = #tpu.dot_dimension_numbers<[1], [0], [0], [1], [0, 0, 1, 1], [], []>} : vector<5x5xf32>, vector<5x5xf32>, vector<5x5xf32> -> vector<5x5xf32>
    %78 = arith.addf %62, %77 : vector<5x5xf32>
    %c16 = arith.constant 16 : index
    %c0_17 = arith.constant 0 : index
    %79 = vector.load %arg1[%c16, %c0_17] : memref<33x35xf32, #tpu.memory_space<vmem>>, vector<1x5xf32>
    %80 = arith.addf %45, %78 : vector<5x5xf32>
    %81 = vector.broadcast %79 : vector<1x5xf32> to vector<5x5xf32>
    %82 = arith.addf %80, %81 : vector<5x5xf32>
    %c24 = arith.constant 24 : index
    %c0_18 = arith.constant 0 : index
    %83 = vector.load %arg1[%c24, %c0_18] : memref<33x35xf32, #tpu.memory_space<vmem>>, vector<5x5xf32>
    %84 = arith.mulf %82, %83 : vector<5x5xf32>
    %cst_19 = arith.constant dense<0.000000e+00> : vector<5xf32>
    %85 = vector.multi_reduction <add>, %84, %cst_19 [1] : vector<5x5xf32> to vector<5xf32>
    %86 = vector.shape_cast %85 : vector<5xf32> to vector<5x1xf32>
    %cst_20 = arith.constant dense<0.000000e+00> : vector<1xf32>
    %87 = vector.multi_reduction <add>, %86, %cst_20 [0] : vector<5x1xf32> to vector<1xf32>
    %88 = vector.shape_cast %87 : vector<1xf32> to vector<1x1xf32>
    %c32 = arith.constant 32 : index
    %c0_21 = arith.constant 0 : index
    %89 = vector.load %arg1[%c32, %c0_21] : memref<33x35xf32, #tpu.memory_space<vmem>>, vector<1x1xf32>
    %90 = arith.addf %88, %89 : vector<1x1xf32>
    %cst_22 = arith.constant 0.000000e+00 : f32
    %91 = vector.broadcast %cst_22 : f32 to vector<1x1xf32>
    %92 = arith.subf %91, %90 : vector<1x1xf32>
    %93 = math.exp %92 : vector<1x1xf32>
    %cst_23 = arith.constant 1.000000e+00 : f32
    %94 = vector.broadcast %cst_23 : f32 to vector<1x1xf32>
    %95 = arith.addf %94, %93 : vector<1x1xf32>
    %96 = tpu.reciprocal %95 {approx = true} : vector<1x1xf32> -> vector<1x1xf32>
    %c0_24 = arith.constant 0 : index
    %c0_25 = arith.constant 0 : index
    %97 = vector.load %arg2[%c0_24, %c0_25] : memref<1x1xf32, #tpu.memory_space<vmem>>, vector<1x1xf32>
    tpu.vector_store %arg2[%c0_24, %c0_25], %96 {strides = array<i32>} : memref<1x1xf32, #tpu.memory_space<vmem>>, vector<1x1xf32>,
    return
  }
}

</mosaic_0001>

<bundles_post_ra>
// kernel: tpu_custom_call.1
= control target key start
LH: loop header
LB: loop body
LE: loop exit
PB: predicated region body
PF: predicated region fallthrough
CT: control target
= control target key end

     0   :  { %7 = vsyncpa [#allocation5], 0  ;;  %s740_s0 = inlined_call_operand.hbm [shape: s32[5], index: 0, kind: input, shape index: {}]   ;;  %s741_s1 = inlined_call_operand.hbm [shape: f32[33,35], index: 1, kind: input, shape index: {}]   ;;  %s742_s2 = inlined_call_operand.hbm [shape: f32[1,1], index: 2, kind: output, shape index: {}]  }
   0x1   :  { %8 = vsyncpa [#allocation3], 0 }
   0x2   :  { %9 = vsyncpa [#allocation4], 0  ;;  %s663_s9 = smov [#allocation2]   ;;  %s664_s12 = smov [#allocation6]  }
   0x3   :  { %17 = dma.hbm_to_smem %s740_s0, 16, %s663_s9, [#allocation5]  }
   0x4   :  { %s23_s13 = sshll.u32 %s664_s12, 4  ;;  %s24_s13 = int_to_ptr.vmem [resolvable:$true] %s23_s13 }
   0x5   :  { %s625_s14 = scalar_lea.vmem %s24_s13, 640  ;;  %p630_p1 = scmp.lt.s32.totalorder %s24_s13, %s24_s13 }
   0x6   :  { %p626_p0 = scmp.ne.s32.totalorder %s24_s13, %s625_s14  ;;  %p631_p2 = scmp.lt.s32.totalorder %s625_s14, %s625_s14 }
   0x8   :  { %p632_p3 = por %p631_p2, %p630_p1 }
   0xa   :  { %p633_p4 = pnand %p632_p3, %p626_p0 }
   0xc   :  { %636 = shalt.err (!%p633_p4)
}
   0xd   :  { %s665_s15 = smov 128   ;;  %s666_s16 = smov 8  }
   0xe   :  { %29 = dma.hbm_to_vmem [thread:$0]  %s741_s1, 640, %s24_s13, [#allocation3], %s665_s15, %s665_s15, %s666_s16  }
   0xf   :  { %657 = dma.done.wait [#allocation5], 16  }
  0x10   :  { %658 = vsyncadd [#allocation5], 4294967280 }
  0x11   :  { %659 = dma.done.wait [#allocation3], 640  }
  0x12   :  { %660 = vsyncadd [#allocation3], 4294966656 }
  0x13   :  { %36 = sfence }
  0x14   :  { %v72_v0 = vld [vmem:[#allocation6 + $0x8] sm:$0x7]  ;;  %vm77_vm0 = vcmask 1042432   ;;  %v37_v1 = vlaneseq  ;;  %v667_v2 = vmov 0.0   ;;  %v71_v3 = vld [vmem:[#allocation6] sm:$0xff]  ;;  %vm743_vm1 = vmmov 0  }
  0x15   :  { %557 = vmatprep.subr.mxu0 %v667_v2  ;;  %561 = vmatprep.mubr.msk.f32.mxu0 %vm743_vm1, %v667_v2  ;;  %s42_s0 = sld [smem:[#allocation2]]  ;;  %s669_s22 = smov 123   ;;  %v545_v51 = vld [vmem:[#allocation6 + $0x10] ss:$0 sm:$0xff]  ;;  %v494_v53 = vld [vmem:[#allocation6 + $0x18] sm:$0x1f] }
  0x16   :  { %558 = vmatpush3.msk.msra.mxu0 %vm77_vm0, %v72_v0  ;;  %v40_v4 = vshrl.u32 %v37_v1, 7  ;;  %s531_s1 = sld [smem:[#allocation2 + $0x1]]  ;;  %564 = vmatprep.subr.mxu1 %v667_v2  ;;  %v38_v5 = vand.u32 127, %v37_v1  ;;  %vm73_vm0 = vcmask 89088   ;;  %s670_s23 = smov 118  }
  0x17   :  { %559 = vmatprep.subr.mxu0 %v667_v2  ;;  %s532_s19 = sld [smem:[#allocation2 + $0x2]]  ;;  %566 = vmatprep.mubr.msk.f32.mxu1 %vm743_vm1, %v667_v2  ;;  %s671_s24 = smov 108   ;;  %v506_v0 = vld [vmem:[#allocation6 + $0x20] sm:$0x1] }
  0x18   :  { %560 = vmatpush3.msra.mxu0 %v71_v3  ;;  %s533_s20 = sld [smem:[#allocation2 + $0x3]]  ;;  %vm41_vm2 = vcmp.eq.s32.totalorder %v40_v4, 0  ;;  %vm47_vm3 = vcmp.eq.s32.totalorder %v40_v4, 1  ;;  %vm53_vm5 = vcmp.eq.s32.totalorder %v40_v4, 2  ;;  %vm59_vm8 = vcmp.eq.s32.totalorder %v40_v4, 3  ;;  %s672_s25 = smov 103  }
  0x19   :  { %s534_s21 = sld [smem:[#allocation2 + $0x4]]  ;;  %569 = vmatprep.subr.mxu0 %v667_v2  ;;  %vm65_vm11 = vcmp.eq.s32.totalorder %v40_v4, 4  ;;  %s673_s26 = smov 98  }
  0x1a   :  { %s674_s27 = smov 113   ;;  %s675_s28 = smov [#allocation7]  }
  0x1b   :  { %v43_v6 = vstv %s42_s0  ;;  %s521_s29 = sshll.u32 %s675_s28, 4  ;;  %s522_s29 = int_to_ptr.vmem [resolvable:$true] %s521_s29 }
  0x1c   :  { %vm44_vm4 = vcmp.eq.s32.totalorder %v38_v5, %v43_v6  ;;  %v49_v7 = vstv %s531_s1  ;;  %s637_s30 = scalar_lea.vmem %s522_s29, 16  ;;  %s641_s3 = scalar_lea.vmem %s522_s29, 32 }
  0x1d   :  { %vm45_vm6 = vmand %vm41_vm2, %vm44_vm4  ;;  %vm50_vm7 = vcmp.eq.s32.totalorder %v38_v5, %v49_v7  ;;  %v55_v8 = vstv %s532_s19  ;;  %vm745_vm2 = vmmov 0   ;;  %vm337_vm4 = vcmask 1044480   ;;  %p638_p5 = scmp.ne.s32.totalorder %s522_s29, %s637_s30  ;;  %p642_p6 = scmp.lt.s32.totalorder %s522_s29, %s522_s29 }
  0x1e   :  { %v46_v9 = vsel %vm45_vm6, 1.0, %v667_v2  ;;  %vm51_vm9 = vmand %vm47_vm3, %vm50_vm7  ;;  %vm56_vm10 = vcmp.eq.s32.totalorder %v38_v5, %v55_v8  ;;  %v61_v10 = vstv %s533_s20  ;;  %vm231_vm3 = vcmask 36864   ;;  %p643_p7 = scmp.lt.s32.totalorder %s641_s3, %s637_s30 }
  0x1f   :  { %v52_v11 = vsel %vm51_vm9, 1.0, %v46_v9  ;;  %vm57_vm12 = vmand %vm53_vm5, %vm56_vm10  ;;  %vm62_vm13 = vcmp.eq.s32.totalorder %v38_v5, %v61_v10  ;;  %v67_v12 = vstv %s534_s21  ;;  %vm513_vm5 = vcmask 0  }
  0x20   :  { %v58_v13 = vsel %vm57_vm12, 1.0, %v52_v11  ;;  %vm63_vm14 = vmand %vm59_vm8, %vm62_vm13  ;;  %vm68_vm15 = vcmp.eq.s32.totalorder %v38_v5, %v67_v12  ;;  %p644_p8 = por %p643_p7, %p642_p6 }
  0x21   :  { %v64_v14 = vsel %vm63_vm14, 1.0, %v58_v13  ;;  %vm69_vm1 = vmand %vm65_vm11, %vm68_vm15 }
  0x22   :  { %v70_v15 = vsel %vm69_vm1, 1.0, %v64_v14  ;;  %vm156_vm1 = vcmask 39936   ;;  %p645_p9 = pnand %p644_p8, %p638_p5 }
  0x23   :  { %562 = vmatmul.mubr.msk.f32.vlgmr.msra.gmra.mxu0 %vm73_vm0, %v70_v15 }
  0x24   :  { %571 = vmatprep.mubr.msk.f32.mxu0 %vm745_vm2, %v667_v2 }
  0xe3   :  { %v708_v16 = vpop.f32.mrf.mxu0 }
  0xe4   :  { %152 = vrot.lane.b32.xlu1 %v708_v16, %s669_s22  ;;  %154 = vrot.lane.b32.xlu0 %v708_v16, %s670_s23 }
  0xe5   :  { %v563_v17 = vpop.f32.mrf.mxu0 }
  0xe8   :  { %243 = vrot.lane.b32.xlu1 %v708_v16, %s671_s24  ;;  %245 = vrot.lane.b32.xlu0 %v708_v16, %s672_s25 }
 0x156   :  { %v155_v18 = vpop.permute.xlu0 %154  ;;  %v153_v19 = vpop.permute.xlu1 %152 }
 0x157   :  { %565 = vmatpush3.xpose.msk.msra.mxu1 %vm156_vm1, %v155_v18 }
 0x158   :  { %574 = vmatprep.subr.mxu1 %v667_v2 }
 0x15a   :  { %567 = vmatmul.mubr.msk.f32.vlgmr.msra.gmra.mxu1 %vm156_vm1, %v153_v19  ;;  %v246_v20 = vpop.permute.xlu0 %245  ;;  %v244_v21 = vpop.permute.xlu1 %243 }
 0x15b   :  { %570 = vmatpush3.xpose.msk.msra.mxu0 %vm156_vm1, %v246_v20  ;;  %576 = vmatprep.mubr.msk.f32.mxu1 %vm745_vm2, %v667_v2 }
 0x15c   :  { %579 = vmatprep.subr.mxu0 %v667_v2 }
 0x15e   :  { %572 = vmatmul.mubr.msk.f32.vlgmr.msra.gmra.mxu0 %vm156_vm1, %v244_v21 }
 0x15f   :  { %581 = vmatprep.mubr.msk.f32.mxu0 %vm745_vm2, %v667_v2 }
 0x21a   :  { %v227_v22 = vpop.f32.mrf.mxu1 }
 0x21b   :  { %v232_v23 = vsel %vm231_vm3, %v227_v22, -inf }
 0x21c   :  { %233 = vmax.xlane.f32.xlu0 %v232_v23  ;;  %v568_v24 = vpop.f32.mrf.mxu1 }
 0x21e   :  { %v317_v25 = vpop.f32.mrf.mxu0 }
 0x21f   :  { %v321_v26 = vsel %vm231_vm3, %v317_v25, -inf }
 0x220   :  { %322 = vmax.xlane.f32.xlu1 %v321_v26  ;;  %v573_v27 = vpop.f32.mrf.mxu0 }
 0x231   :  { %332 = vrot.lane.b32.xlu1 %v708_v16, %s673_s26 }
 0x2a5   :  { %v234_v28 = vpop.xlane.xlu0 %233 }
 0x2a6   :  { %v235_v29 = vsub.f32 %v227_v22, %v234_v28 }
 0x2a8   :  { %v236_v30 = vmul.f32 1.442695, %v235_v29 }
 0x2a9   :  { %v323_v31 = vpop.xlane.xlu1 %322 }
 0x2aa   :  { %597 = vpow2.f32 %v236_v30  ;;  %v324_v32 = vsub.f32 %v317_v25, %v323_v31 }
 0x2ac   :  { %v325_v33 = vmul.f32 1.442695, %v324_v32 }
 0x2ad   :  { %v333_v34 = vpop.permute.xlu1 %332 }
 0x2ae   :  { %599 = vpow2.f32 %v325_v33  ;;  %575 = vmatpush3.msk.msra.mxu1 %vm337_vm4, %v333_v34 }
 0x2b7   :  { %v598_v35 = vpop.eup %597 }
 0x2b8   :  { %v238_v36 = vsel %vm231_vm3, %v598_v35, 0.0 }
 0x2b9   :  { %239 = vadd.xlane.f32.xlu0 %v238_v36 }
 0x2bb   :  { %v600_v37 = vpop.eup %599 }
 0x2bc   :  { %v327_v38 = vsel %vm231_vm3, %v600_v37, 0.0 }
 0x2bd   :  { %328 = vadd.xlane.f32.xlu0 %v327_v38 }
 0x2d3   :  { %410 = vrot.lane.b32.xlu0 %v708_v16, %s674_s27 }
 0x342   :  { %v240_v39 = vpop.xlane.xlu0 %239 }
 0x343   :  { %601 = vrcp.f32 %v240_v39 }
 0x346   :  { %v329_v40 = vpop.xlane.xlu0 %328 }
 0x347   :  { %603 = vrcp.f32 %v329_v40 }
 0x34a   :  { %v411_v41 = vpop.permute.xlu0 %410 }
 0x34b   :  { %580 = vmatpush3.msk.msra.mxu0 %vm337_vm4, %v411_v41 }
 0x350   :  { %v602_v42 = vpop.eup %601 }
 0x351   :  { %v242_v43 = vmul.f32 %v602_v42, %v598_v35 }
 0x353   :  { %582 = vmatmul.mubr.msk.f32.vlgmr.msra.gmra.mxu0 %vm156_vm1, %v242_v43 }
 0x354   :  { %v604_v44 = vpop.eup %603 }
 0x355   :  { %v331_v45 = vmul.f32 %v604_v44, %v600_v37 }
 0x357   :  { %577 = vmatmul.mubr.msk.f32.vlgmr.msra.gmra.mxu1 %vm156_vm1, %v331_v45 }
 0x413   :  { %v483_v46 = vpop.f32.mrf.mxu0 }
 0x415   :  { %v583_v47 = vpop.f32.mrf.mxu0 }
 0x417   :  { %v406_v48 = vpop.f32.mrf.mxu1 }
 0x418   :  { %v484_v49 = vadd.f32 %v483_v46, %v406_v48 }
 0x419   :  { %v578_v50 = vpop.f32.mrf.mxu1 }
 0x41a   :  { %v488_v52 = vadd.f32 %v484_v49, %v708_v16 }
 0x41c   :  { %v493_v54 = vadd.f32 %v545_v51, %v488_v52 }
 0x41e   :  { %v495_v55 = vmul.f32 %v494_v53, %v493_v54 }
 0x420   :  { %v496_v56 = vsel %vm231_vm3, %v495_v55, 0.0 }
 0x421   :  { %497 = vadd.xlane.f32.xlu1 %v496_v56 }
 0x4aa   :  { %v498_v57 = vpop.xlane.xlu1 %497 }
 0x4ab   :  { %v499_v58 = vsel %vm337_vm4, %v498_v57, 0.0 }
 0x4ac   :  { %v500_v59 = vrot.slane %v499_v58, 4 }
 0x4ae   :  { %v501_v60 = vadd.f32 %v500_v59, %v499_v58 }
 0x4b0   :  { %v502_v61 = vrot.slane %v501_v60, 2 }
 0x4b2   :  { %v503_v62 = vadd.f32 %v502_v61, %v501_v60 }
 0x4b4   :  { %v504_v63 = vrot.slane %v503_v62, 1 }
 0x4b6   :  { %v505_v1 = vadd.f32 %v504_v63, %v503_v62 }
 0x4b8   :  { %v507_v2 = vadd.f32 %v506_v0, %v505_v1 }
 0x4ba   :  { %v508_v3 = vsub.f32 0.0, %v507_v2 }
 0x4bc   :  { %v509_v4 = vmul.f32 1.442695, %v508_v3 }
 0x4be   :  { %605 = vpow2.f32 %v509_v4 }
 0x4cb   :  { %v606_v5 = vpop.eup %605 }
 0x4cc   :  { %v511_v6 = vadd.f32 1.0, %v606_v5 }
 0x4ce   :  { %607 = vrcp.f32 %v511_v6 }
 0x4db   :  { %v608_v7 = vpop.eup %607 }
 0x4dc   :  { %514 = vst.msk [vmem:[#allocation7] sm:$0x1] %vm513_vm5, %v608_v7 }
 0x4dd   :  { %648 = shalt.err (!%p645_p9)
}
 0x4de   :  { %524 = dma.vmem_to_hbm [thread:$0]  %s522_s29, 16, %s742_s2, [#allocation4]  }
 0x4df   :  { %661 = dma.done.wait [#allocation4], 16  }
 0x4e0   :  { %662 = vsyncadd [#allocation4], 4294967280 }
 0x4e1   :  { %528 = vsyncpa [#allocation3], 1 }
 0x4e2   :  { %529 = vsyncpa [#allocation4], 1 }
 0x4e3   :  { %530 = vsyncpa [#allocation5], 1 }

</bundles_post_ra>
